<compile_context>
chip_gen: v6e
topology: v6e:2x2x1
jax: 0.10.0
libtpu: 0.0.40
codegen_flags: <defaults>
</compile_context>

<pallas_src>
import functools

import jax
import jax.numpy as jnp
import numpy as np
from jax.experimental import pallas as pl
from jax.experimental.pallas import tpu as pltpu

EPS = 1e-5
_NC = 2          # leading "parallel" grid axis (v7x megacore); fine on 1-TC chips
_STAT_ROWS = 8   # per-core stats padded to a full (8, lane) sublane tile


# ---------------------------------------------------------------------------
# helpers
# ---------------------------------------------------------------------------
def _round_up(n, m):
    return (n + m - 1) // m * m


def _pad2(a, rows, cols, fill=0.0):
    a = jnp.asarray(a, jnp.float32)
    return jnp.pad(a, ((0, rows - a.shape[0]), (0, cols - a.shape[1])),
                   constant_values=fill)


def _vmem_capacity():
    # Per-generation VMEM (v5e/v6e: 128 MiB, v7x: 64 MiB per TensorCore).
    try:
        cap = getattr(pltpu.get_tpu_info(), "vmem_capacity_bytes", None)
        if cap:
            return int(cap)
    except Exception:
        pass
    return 64 << 20           # conservative default (v7x per-core VMEM)


def _vmem_limit(resident_bytes, streamed_bytes):
    # Resident blocks counted 1x (single-buffered), streamed blocks 2x
    # (double-buffered), plus slack for semaphores / compiler scratch.
    cap = _vmem_capacity()
    hard_cap = min(3 * cap // 4, 64 << 20)   # ~48 MiB on v7x, 64 MiB on v5e/v6e
    need = int(resident_bytes + 2 * streamed_bytes + (2 << 20))
    return int(min(max(need, 8 << 20), hard_cap))


def _pick_tb(batch, k_max, n_max, resident_bytes):
    # Largest batch tile whose double-buffered streamed tiles fit next to the
    # resident weights within the per-generation VMEM budget.
    usable = int(_vmem_capacity() * 0.70)
    per_row = 2 * 4 * (k_max + n_max)            # f32 worst case, in + out tile
    tb = (usable - int(resident_bytes) - (4 << 20)) // max(per_row, 1)
    tb = max(16, min(1024, tb)) // 16 * 16       # mult of 16: bf16 sublane pack
    want = _round_up(max(1, (batch + _NC - 1) // _NC), 16)
    return int(min(tb, want))


def _make_res_spec(buffered):
    """Resident (constant index_map) block spec factory.

    Single-buffers the block (pipeline_mode=pl.Buffered(1)) when supported;
    constant-index blocks need no double buffer and large f32/bf16 weights
    would otherwise eat 2x VMEM.
    """
    def spec(block, index_map):
        if buffered:
            try:
                return pl.BlockSpec(block, index_map,
                                    pipeline_mode=pl.Buffered(1))
            except Exception:
                pass
        return pl.BlockSpec(block, index_map)
    return spec


# ---------------------------------------------------------------------------
# kernels
# ---------------------------------------------------------------------------
def _linear_stats_kernel(x_ref, w_ref, h_ref, sum_ref, ssq_ref, *,
                         compute_dtype):
    # h = x @ W1 (bias dropped: BatchNorm's mean subtraction cancels it).
    h = jnp.dot(x_ref[...].astype(compute_dtype), w_ref[...],
                preferred_element_type=jnp.float32)
    h_ref[...] = h.astype(h_ref.dtype)           # bf16 at the HBM boundary

    @pl.when(pl.program_id(1) == 0)
    def _():
        sum_ref[...] = jnp.zeros_like(sum_ref)
        ssq_ref[...] = jnp.zeros_like(ssq_ref)

    # Per-core partial stats, f32, computed from the pre-cast f32 value.
    sum_ref[0:1, :] += jnp.sum(h, axis=0, keepdims=True)
    ssq_ref[0:1, :] += jnp.sum(h * h, axis=0, keepdims=True)


def _bn_linear_stats_kernel(h_ref, s_ref, q_ref, g_ref, be_ref, w_ref,
                            o_ref, sum_ref, ssq_ref, *,
                            inv_n, tb, batch, nbh, mask_rows, compute_dtype):
    c, i = pl.program_id(0), pl.program_id(1)
    # Fold training-mode BatchNorm into one FMA.  All BN math in f32 (v5e has
    # no bf16 VALU).  LeakyReLU(True): negative_slope == 1.0 -> identity.
    s = jnp.sum(s_ref[...], axis=0, keepdims=True)   # reduce per-core partials
    q = jnp.sum(q_ref[...], axis=0, keepdims=True)
    mean = s * inv_n
    var = jnp.maximum(q * inv_n - mean * mean, 0.0)
    scale = g_ref[...] * jax.lax.rsqrt(var + EPS)
    shift = be_ref[...] - mean * scale
    hn = h_ref[...].astype(jnp.float32) * scale + shift
    if mask_rows:
        # Zero batch-padding rows so the next layer's stats stay exact.
        row = tb * (c * nbh + i) + jax.lax.broadcasted_iota(jnp.int32, (tb, 1), 0)
        hn = jnp.where(row < batch, hn, 0.0)
    h2 = jnp.dot(hn.astype(compute_dtype), w_ref[...],
                 preferred_element_type=jnp.float32)
    o_ref[...] = h2.astype(o_ref.dtype)

    @pl.when(i == 0)
    def _():
        sum_ref[...] = jnp.zeros_like(sum_ref)
        ssq_ref[...] = jnp.zeros_like(ssq_ref)

    sum_ref[0:1, :] += jnp.sum(h2, axis=0, keepdims=True)
    ssq_ref[0:1, :] += jnp.sum(h2 * h2, axis=0, keepdims=True)


def _bn_linear_out_kernel(h_ref, s_ref, q_ref, g_ref, be_ref, w_ref, b3_ref,
                          o_ref, *, inv_n, compute_dtype):
    s = jnp.sum(s_ref[...], axis=0, keepdims=True)
    q = jnp.sum(q_ref[...], axis=0, keepdims=True)
    mean = s * inv_n
    var = jnp.maximum(q * inv_n - mean * mean, 0.0)
    scale = g_ref[...] * jax.lax.rsqrt(var + EPS)
    shift = be_ref[...] - mean * scale
    hn = h_ref[...].astype(jnp.float32) * scale + shift
    o_ref[...] = (jnp.dot(hn.astype(compute_dtype), w_ref[...],
                          preferred_element_type=jnp.float32) + b3_ref[...])


# ---------------------------------------------------------------------------
# forward
# ---------------------------------------------------------------------------
def _forward(x, params, compute_dtype, buffered_resident):
    B, in_dim = x.shape
    h1 = params["w1"].shape[1]
    h2 = params["w2"].shape[1]
    out_dim = params["w3"].shape[1]

    # Lane-dense padding (MXU tiles + unmasked vector stores).
    Kp = _round_up(in_dim, 128)
    H1p = _round_up(h1, 128)
    H2p = _round_up(h2, 128)
    Op = _round_up(out_dim, 128)

    act_bytes = jnp.dtype(compute_dtype).itemsize
    w_res = act_bytes * max(Kp * H1p, H1p * H2p, H2p * Op)
    TB = _pick_tb(B, max(Kp, H1p, H2p), max(H1p, H2p, Op), w_res)
    Bp = _round_up(B, _NC * TB)
    nbh = Bp // (_NC * TB)      # batch tiles per core
    nb = _NC * nbh

    xp = _pad2(x, Bp, Kp)
    w1p = _pad2(params["w1"], Kp, H1p).astype(compute_dtype)
    w2p = _pad2(params["w2"], H1p, H2p).astype(compute_dtype)
    w3p = _pad2(params["w3"], H2p, Op).astype(compute_dtype)
    b3p = _pad2(params["b3"], 1, Op)
    g1p = _pad2(params["g1"], 1, H1p, fill=1.0)
    be1p = _pad2(params["be1"], 1, H1p)
    g2p = _pad2(params["g2"], 1, H2p, fill=1.0)
    be2p = _pad2(params["be2"], 1, H2p)
    # params["b1"], params["b2"] intentionally unused (cancelled by BN mean).

    res = _make_res_spec(buffered_resident)
    row2 = lambda blk: pl.BlockSpec(blk, lambda c, i: (c * nbh + i, 0))
    row1 = lambda blk: pl.BlockSpec(blk, lambda i: (i, 0))
    stat_spec = lambda H: pl.BlockSpec((_STAT_ROWS, H), lambda c, i: (c, 0))
    stat_rows = _NC * _STAT_ROWS

    # ---- layer 1: h1 = x @ W1, per-core streaming sum/sumsq of h1 ----------
    h1_act, s1, q1 = pl.pallas_call(
        functools.partial(_linear_stats_kernel, compute_dtype=compute_dtype),
        out_shape=(jax.ShapeDtypeStruct((Bp, H1p), compute_dtype),
                   jax.ShapeDtypeStruct((stat_rows, H1p), jnp.float32),
                   jax.ShapeDtypeStruct((stat_rows, H1p), jnp.float32)),
        grid_spec=pltpu.PrefetchScalarGridSpec(
            num_scalar_prefetch=0, grid=(_NC, nbh),
            in_specs=[row2((TB, Kp)),
                      res((Kp, H1p), lambda c, i: (0, 0))],
            out_specs=(row2((TB, H1p)), stat_spec(H1p), stat_spec(H1p))),
        compiler_params=pltpu.CompilerParams(
            dimension_semantics=("parallel", "arbitrary"),
            vmem_limit_bytes=_vmem_limit(act_bytes * Kp * H1p,
                                         4 * TB * Kp + act_bytes * TB * H1p)),
        cost_estimate=pl.CostEstimate(
            flops=2 * Bp * Kp * H1p, transcendentals=0,
            bytes_accessed=4 * Bp * Kp + act_bytes * (Kp * H1p + Bp * H1p)),
    )(xp, w1p)

    # ---- layer 2: h2 = BN1(h1) @ W2, per-core streaming sum/sumsq of h2 ----
    k2 = functools.partial(
        _bn_linear_stats_kernel, inv_n=1.0 / B, tb=TB, batch=B, nbh=nbh,
        mask_rows=(Bp != B), compute_dtype=compute_dtype)
    h2_act, s2, q2 = pl.pallas_call(
        k2,
        out_shape=(jax.ShapeDtypeStruct((Bp, H2p), compute_dtype),
                   jax.ShapeDtypeStruct((stat_rows, H2p), jnp.float32),
                   jax.ShapeDtypeStruct((stat_rows, H2p), jnp.float32)),
        grid_spec=pltpu.PrefetchScalarGridSpec(
            num_scalar_prefetch=0, grid=(_NC, nbh),
            in_specs=[row2((TB, H1p)),
                      res((stat_rows, H1p), lambda c, i: (0, 0)),
                      res((stat_rows, H1p), lambda c, i: (0, 0)),
                      res((1, H1p), lambda c, i: (0, 0)),
                      res((1, H1p), lambda c, i: (0, 0)),
                      res((H1p, H2p), lambda c, i: (0, 0))],
            out_specs=(row2((TB, H2p)), stat_spec(H2p), stat_spec(H2p))),
        compiler_params=pltpu.CompilerParams(
            dimension_semantics=("parallel", "arbitrary"),
            vmem_limit_bytes=_vmem_limit(act_bytes * H1p * H2p,
                                         act_bytes * TB * (H1p + H2p))),
        cost_estimate=pl.CostEstimate(
            flops=2 * Bp * H1p * H2p, transcendentals=0,
            bytes_accessed=act_bytes * (Bp * H1p + H1p * H2p + Bp * H2p)),
    )(h1_act, s1, q1, g1p, be1p, w2p)

    # ---- layer 3: out = BN2(h2) @ W3 + b3 (no cross-tile state: parallel) --
    k3 = functools.partial(_bn_linear_out_kernel, inv_n=1.0 / B,
                           compute_dtype=compute_dtype)
    out_p = pl.pallas_call(
        k3,
        out_shape=jax.ShapeDtypeStruct((Bp, Op), jnp.float32),
        grid_spec=pltpu.PrefetchScalarGridSpec(
            num_scalar_prefetch=0, grid=(nb,),
            in_specs=[row1((TB, H2p)),
                      res((stat_rows, H2p), lambda i: (0, 0)),
                      res((stat_rows, H2p), lambda i: (0, 0)),
                      res((1, H2p), lambda i: (0, 0)),
                      res((1, H2p), lambda i: (0, 0)),
                      res((H2p, Op), lambda i: (0, 0)),
                      res((1, Op), lambda i: (0, 0))],
            out_specs=row1((TB, Op))),
        compiler_params=pltpu.CompilerParams(
            dimension_semantics=("parallel",),
            vmem_limit_bytes=_vmem_limit(act_bytes * H2p * Op,
                                         act_bytes * TB * H2p + 4 * TB * Op)),
        cost_estimate=pl.CostEstimate(
            flops=2 * Bp * H2p * Op, transcendentals=0,
            bytes_accessed=act_bytes * (Bp * H2p + H2p * Op) + 4 * Bp * Op),
    )(h2_act, s2, q2, g2p, be2p, w3p, b3p)

    return out_p[:B, :out_dim]


def batch_net_large(x, params, *, compute_dtype=jnp.bfloat16):
    """Forward pass of Batch_Net_large.

    compute_dtype is the storage dtype of the streamed activations / resident
    weights and the MXU operand dtype (accumulation and all BatchNorm math
    stay f32).  bf16 halves HBM traffic of the memory-bound layers; use
    jnp.float32 for bit-faithful numerics.
    """
    try:
        return _forward(x, params, compute_dtype, buffered_resident=True)
    except Exception:
        # pl.Buffered(1) (single-buffered resident blocks) rejected by this
        # jax/libtpu combination -> retry with default double buffering.
        return _forward(x, params, compute_dtype, buffered_resident=False)


# ---------------------------------------------------------------------------
# params / reference
# ---------------------------------------------------------------------------
def init_params(key, in_dim, h1, h2, out_dim):
    ks = jax.random.split(key, 6)

    def lin(k, fan_in, fan_out):
        bound = 1.0 / np.sqrt(fan_in)
        kw, kb = jax.random.split(k)
        w = jax.random.uniform(kw, (fan_in, fan_out), jnp.float32, -bound, bound)
        b = jax.random.uniform(kb, (1, fan_out), jnp.float32, -bound, bound)
        return w, b

    w1, b1 = lin(ks[0], in_dim, h1)
    w2, b2 = lin(ks[1], h1, h2)
    w3, b3 = lin(ks[2], h2, out_dim)
    g1 = 1.0 + 0.1 * jax.random.normal(ks[3], (1, h1), jnp.float32)
    be1 = 0.1 * jax.random.normal(ks[4], (1, h1), jnp.float32)
    g2 = 1.0 + 0.1 * jax.random.normal(ks[5], (1, h2), jnp.float32)
    be2 = 0.1 * jax.random.normal(jax.random.fold_in(key, 7), (1, h2), jnp.float32)
    return dict(w1=w1, b1=b1, g1=g1, be1=be1,
                w2=w2, b2=b2, g2=g2, be2=be2,
                w3=w3, b3=b3)


def reference(x, p):
    # Faithful pure-JAX f32 reference of the PyTorch forward (keeps b1/b2 and
    # the identity "LeakyReLU(True)" explicitly).
    def bn_lrelu(h, g, b):
        mean = jnp.mean(h, axis=0, keepdims=True)
        var = jnp.mean((h - mean) ** 2, axis=0, keepdims=True)
        hn = (h - mean) * jax.lax.rsqrt(var + EPS) * g + b
        return jnp.where(hn >= 0, hn, 1.0 * hn)   # slope True==1.0 -> identity

    h1 = bn_lrelu(x @ p["w1"] + p["b1"], p["g1"], p["be1"])
    h2 = bn_lrelu(h1 @ p["w2"] + p["b2"], p["g2"], p["be2"])
    return h2 @ p["w3"] + p["b3"]


if __name__ == "__main__":
    B, in_dim, h1, h2, out_dim = 8, 16, 32, 32, 8
    key = jax.random.PRNGKey(0)
    kx, kp = jax.random.split(key)
    x = jax.random.normal(kx, (B, in_dim), jnp.float32)
    params = init_params(kp, in_dim, h1, h2, out_dim)

    ref = jax.block_until_ready(reference(x, params))

    # Exact-precision path (f32 end to end) -> tight check.
    out_f32 = jax.block_until_ready(
        batch_net_large(x, params, compute_dtype=jnp.float32))
    np.testing.assert_allclose(np.asarray(out_f32), np.asarray(ref),
                               rtol=1e-4, atol=1e-4)

    # Bandwidth-optimized path (bf16 activations/weights, f32 accumulation
    # and BN stats) -> loose sanity check against the f32 reference.
    out_bf16 = jax.block_until_ready(
        batch_net_large(x, params, compute_dtype=jnp.bfloat16))
    np.testing.assert_allclose(np.asarray(out_bf16), np.asarray(ref),
                               rtol=1e-1, atol=1.5e-1)

    print("KERNEL_OK")
</pallas_src>

<mosaic_0001>
module attributes {stable_mosaic.version = 11 : i64} {
  func.func @_linear_stats_kernel(%arg0: i32, %arg1: i32, %arg2: memref<16x128xf32, #tpu.memory_space<vmem>>, %arg3: memref<128x128xf32, #tpu.memory_space<vmem>>, %arg4: memref<16x128xf32, #tpu.memory_space<vmem>>, %arg5: memref<8x128xf32, #tpu.memory_space<vmem>>, %arg6: memref<8x128xf32, #tpu.memory_space<vmem>>) attributes {dimension_semantics = [#tpu.dimension_semantics<parallel>, #tpu.dimension_semantics<arbitrary>], iteration_bounds = array<i64: 2, 1>, scalar_prefetch = 0 : i64, scratch_operands = 0 : i64, tpu.core_type = #tpu.core_type<tc>, window_params = [{transform_indices = @transform_0, window_bounds = array<i64: 16, 128>}, {pipeline_mode = #tpu.pipeline_mode<synchronous>, transform_indices = @transform_1, window_bounds = array<i64: 128, 128>}, {transform_indices = @transform_2, window_bounds = array<i64: 16, 128>}, {transform_indices = @transform_3, window_bounds = array<i64: 8, 128>}, {transform_indices = @transform_4, window_bounds = array<i64: 8, 128>}]} {
    %c0 = arith.constant 0 : index
    %c0_0 = arith.constant 0 : index
    %0 = vector.load %arg2[%c0, %c0_0] : memref<16x128xf32, #tpu.memory_space<vmem>>, vector<16x128xf32>
    %c0_1 = arith.constant 0 : index
    %c0_2 = arith.constant 0 : index
    %1 = vector.load %arg3[%c0_1, %c0_2] : memref<128x128xf32, #tpu.memory_space<vmem>>, vector<128x128xf32>
    %cst = arith.constant dense<0.000000e+00> : vector<16x128xf32>
    %2 = tpu.matmul %0, %1, %cst {dimension_numbers = #tpu.dot_dimension_numbers<[1], [0], [0], [1], [0, 0, 1, 1], [], []>} : vector<16x128xf32>, vector<128x128xf32>, vector<16x128xf32> -> vector<16x128xf32>
    %c0_3 = arith.constant 0 : index
    %c0_4 = arith.constant 0 : index
    %3 = vector.load %arg4[%c0_3, %c0_4] : memref<16x128xf32, #tpu.memory_space<vmem>>, vector<16x128xf32>
    tpu.vector_store %arg4[%c0_3, %c0_4], %2 {strides = array<i32>} : memref<16x128xf32, #tpu.memory_space<vmem>>, vector<16x128xf32>,
    %c0_i32 = arith.constant 0 : i32
    %4 = arith.cmpi eq, %arg1, %c0_i32 : i32
    %5 = arith.extui %4 : i1 to i32
    %c0_i32_5 = arith.constant 0 : i32
    %6 = arith.cmpi ne, %5, %c0_i32_5 : i32
    scf.if %6 {
      %cst_16 = arith.constant 0.000000e+00 : f32
      %18 = vector.broadcast %cst_16 : f32 to vector<8x128xf32>
      %c0_17 = arith.constant 0 : index
      %c0_18 = arith.constant 0 : index
      %19 = vector.load %arg5[%c0_17, %c0_18] : memref<8x128xf32, #tpu.memory_space<vmem>>, vector<8x128xf32>
      tpu.vector_store %arg5[%c0_17, %c0_18], %18 {strides = array<i32>} : memref<8x128xf32, #tpu.memory_space<vmem>>, vector<8x128xf32>,
      %cst_19 = arith.constant 0.000000e+00 : f32
      %20 = vector.broadcast %cst_19 : f32 to vector<8x128xf32>
      %c0_20 = arith.constant 0 : index
      %c0_21 = arith.constant 0 : index
      %21 = vector.load %arg6[%c0_20, %c0_21] : memref<8x128xf32, #tpu.memory_space<vmem>>, vector<8x128xf32>
      tpu.vector_store %arg6[%c0_20, %c0_21], %20 {strides = array<i32>} : memref<8x128xf32, #tpu.memory_space<vmem>>, vector<8x128xf32>,
    } else {
    }
    %c0_6 = arith.constant 0 : index
    %c0_7 = arith.constant 0 : index
    %7 = vector.load %arg5[%c0_6, %c0_7] : memref<8x128xf32, #tpu.memory_space<vmem>>, vector<1x128xf32>
    %cst_8 = arith.constant dense<0.000000e+00> : vector<128xf32>
    %8 = vector.multi_reduction <add>, %2, %cst_8 [0] : vector<16x128xf32> to vector<128xf32>
    %9 = vector.shape_cast %8 : vector<128xf32> to vector<1x128xf32>
    %10 = arith.addf %7, %9 : vector<1x128xf32>
    %c0_9 = arith.constant 0 : index
    %c0_10 = arith.constant 0 : index
    %11 = vector.load %arg5[%c0_9, %c0_10] : memref<8x128xf32, #tpu.memory_space<vmem>>, vector<1x128xf32>
    tpu.vector_store %arg5[%c0_9, %c0_10], %10 {strides = array<i32>} : memref<8x128xf32, #tpu.memory_space<vmem>>, vector<1x128xf32>,
    %c0_11 = arith.constant 0 : index
    %c0_12 = arith.constant 0 : index
    %12 = vector.load %arg6[%c0_11, %c0_12] : memref<8x128xf32, #tpu.memory_space<vmem>>, vector<1x128xf32>
    %13 = arith.mulf %2, %2 : vector<16x128xf32>
    %cst_13 = arith.constant dense<0.000000e+00> : vector<128xf32>
    %14 = vector.multi_reduction <add>, %13, %cst_13 [0] : vector<16x128xf32> to vector<128xf32>
    %15 = vector.shape_cast %14 : vector<128xf32> to vector<1x128xf32>
    %16 = arith.addf %12, %15 : vector<1x128xf32>
    %c0_14 = arith.constant 0 : index
    %c0_15 = arith.constant 0 : index
    %17 = vector.load %arg6[%c0_14, %c0_15] : memref<8x128xf32, #tpu.memory_space<vmem>>, vector<1x128xf32>
    tpu.vector_store %arg6[%c0_14, %c0_15], %16 {strides = array<i32>} : memref<8x128xf32, #tpu.memory_space<vmem>>, vector<1x128xf32>,
    return
  }
  func.func @transform_0(%arg0: i32, %arg1: i32) -> (i32, i32) {
    %c1_i32 = arith.constant 1 : i32
    %0 = arith.muli %arg0, %c1_i32 : i32
    %1 = arith.addi %0, %arg1 : i32
    %c0_i32 = arith.constant 0 : i32
    %c0_i32_0 = arith.constant 0 : i32
    return %1, %c0_i32 : i32, i32
  }
  func.func @transform_1(%arg0: i32, %arg1: i32) -> (i32, i32) {
    %c0_i32 = arith.constant 0 : i32
    %c0_i32_0 = arith.constant 0 : i32
    %c0_i32_1 = arith.constant 0 : i32
    return %c0_i32, %c0_i32_0 : i32, i32
  }
  func.func @transform_2(%arg0: i32, %arg1: i32) -> (i32, i32) {
    %c1_i32 = arith.constant 1 : i32
    %0 = arith.muli %arg0, %c1_i32 : i32
    %1 = arith.addi %0, %arg1 : i32
    %c0_i32 = arith.constant 0 : i32
    %c0_i32_0 = arith.constant 0 : i32
    return %1, %c0_i32 : i32, i32
  }
  func.func @transform_3(%arg0: i32, %arg1: i32) -> (i32, i32) {
    %c0_i32 = arith.constant 0 : i32
    %c0_i32_0 = arith.constant 0 : i32
    return %arg0, %c0_i32 : i32, i32
  }
  func.func @transform_4(%arg0: i32, %arg1: i32) -> (i32, i32) {
    %c0_i32 = arith.constant 0 : i32
    %c0_i32_0 = arith.constant 0 : i32
    return %arg0, %c0_i32 : i32, i32
  }
}

module attributes {stable_mosaic.version = 11 : i64} {
  func.func @_linear_stats_kernel(%arg0: i32, %arg1: i32, %arg2: memref<16x128xf32, #tpu.memory_space<vmem>>, %arg3: memref<128x128xf32, #tpu.memory_space<vmem>>, %arg4: memref<16x128xf32, #tpu.memory_space<vmem>>, %arg5: memref<8x128xf32, #tpu.memory_space<vmem>>, %arg6: memref<8x128xf32, #tpu.memory_space<vmem>>) attributes {dimension_semantics = [#tpu.dimension_semantics<parallel>, #tpu.dimension_semantics<arbitrary>], iteration_bounds = array<i64: 2, 1>, scalar_prefetch = 0 : i64, scratch_operands = 0 : i64, tpu.core_type = #tpu.core_type<tc>, window_params = [{transform_indices = @transform_0, window_bounds = array<i64: 16, 128>}, {pipeline_mode = #tpu.pipeline_mode<synchronous>, transform_indices = @transform_1, window_bounds = array<i64: 128, 128>}, {transform_indices = @transform_2, window_bounds = array<i64: 16, 128>}, {transform_indices = @transform_3, window_bounds = array<i64: 8, 128>}, {transform_indices = @transform_4, window_bounds = array<i64: 8, 128>}]} {
    %c0 = arith.constant 0 : index
    %c0_0 = arith.constant 0 : index
    %0 = vector.load %arg2[%c0, %c0_0] : memref<16x128xf32, #tpu.memory_space<vmem>>, vector<16x128xf32>
    %c0_1 = arith.constant 0 : index
    %c0_2 = arith.constant 0 : index
    %1 = vector.load %arg3[%c0_1, %c0_2] : memref<128x128xf32, #tpu.memory_space<vmem>>, vector<128x128xf32>
    %cst = arith.constant dense<0.000000e+00> : vector<16x128xf32>
    %2 = tpu.matmul %0, %1, %cst {dimension_numbers = #tpu.dot_dimension_numbers<[1], [0], [0], [1], [0, 0, 1, 1], [], []>} : vector<16x128xf32>, vector<128x128xf32>, vector<16x128xf32> -> vector<16x128xf32>
    %c0_3 = arith.constant 0 : index
    %c0_4 = arith.constant 0 : index
    %3 = vector.load %arg4[%c0_3, %c0_4] : memref<16x128xf32, #tpu.memory_space<vmem>>, vector<16x128xf32>
    tpu.vector_store %arg4[%c0_3, %c0_4], %2 {strides = array<i32>} : memref<16x128xf32, #tpu.memory_space<vmem>>, vector<16x128xf32>,
    %c0_i32 = arith.constant 0 : i32
    %4 = arith.cmpi eq, %arg1, %c0_i32 : i32
    %5 = arith.extui %4 : i1 to i32
    %c0_i32_5 = arith.constant 0 : i32
    %6 = arith.cmpi ne, %5, %c0_i32_5 : i32
    scf.if %6 {
      %cst_16 = arith.constant 0.000000e+00 : f32
      %18 = vector.broadcast %cst_16 : f32 to vector<8x128xf32>
      %c0_17 = arith.constant 0 : index
      %c0_18 = arith.constant 0 : index
      %19 = vector.load %arg5[%c0_17, %c0_18] : memref<8x128xf32, #tpu.memory_space<vmem>>, vector<8x128xf32>
      tpu.vector_store %arg5[%c0_17, %c0_18], %18 {strides = array<i32>} : memref<8x128xf32, #tpu.memory_space<vmem>>, vector<8x128xf32>,
      %cst_19 = arith.constant 0.000000e+00 : f32
      %20 = vector.broadcast %cst_19 : f32 to vector<8x128xf32>
      %c0_20 = arith.constant 0 : index
      %c0_21 = arith.constant 0 : index
      %21 = vector.load %arg6[%c0_20, %c0_21] : memref<8x128xf32, #tpu.memory_space<vmem>>, vector<8x128xf32>
      tpu.vector_store %arg6[%c0_20, %c0_21], %20 {strides = array<i32>} : memref<8x128xf32, #tpu.memory_space<vmem>>, vector<8x128xf32>,
    } else {
    }
    %c0_6 = arith.constant 0 : index
    %c0_7 = arith.constant 0 : index
    %7 = vector.load %arg5[%c0_6, %c0_7] : memref<8x128xf32, #tpu.memory_space<vmem>>, vector<1x128xf32>
    %cst_8 = arith.constant dense<0.000000e+00> : vector<128xf32>
    %8 = vector.multi_reduction <add>, %2, %cst_8 [0] : vector<16x128xf32> to vector<128xf32>
    %9 = vector.shape_cast %8 : vector<128xf32> to vector<1x128xf32>
    %10 = arith.addf %7, %9 : vector<1x128xf32>
    %c0_9 = arith.constant 0 : index
    %c0_10 = arith.constant 0 : index
    %11 = vector.load %arg5[%c0_9, %c0_10] : memref<8x128xf32, #tpu.memory_space<vmem>>, vector<1x128xf32>
    tpu.vector_store %arg5[%c0_9, %c0_10], %10 {strides = array<i32>} : memref<8x128xf32, #tpu.memory_space<vmem>>, vector<1x128xf32>,
    %c0_11 = arith.constant 0 : index
    %c0_12 = arith.constant 0 : index
    %12 = vector.load %arg6[%c0_11, %c0_12] : memref<8x128xf32, #tpu.memory_space<vmem>>, vector<1x128xf32>
    %13 = arith.mulf %2, %2 : vector<16x128xf32>
    %cst_13 = arith.constant dense<0.000000e+00> : vector<128xf32>
    %14 = vector.multi_reduction <add>, %13, %cst_13 [0] : vector<16x128xf32> to vector<128xf32>
    %15 = vector.shape_cast %14 : vector<128xf32> to vector<1x128xf32>
    %16 = arith.addf %12, %15 : vector<1x128xf32>
    %c0_14 = arith.constant 0 : index
    %c0_15 = arith.constant 0 : index
    %17 = vector.load %arg6[%c0_14, %c0_15] : memref<8x128xf32, #tpu.memory_space<vmem>>, vector<1x128xf32>
    tpu.vector_store %arg6[%c0_14, %c0_15], %16 {strides = array<i32>} : memref<8x128xf32, #tpu.memory_space<vmem>>, vector<1x128xf32>,
    return
  }
  func.func @transform_0(%arg0: i32, %arg1: i32) -> (i32, i32) {
    %c1_i32 = arith.constant 1 : i32
    %0 = arith.muli %arg0, %c1_i32 : i32
    %1 = arith.addi %0, %arg1 : i32
    %c0_i32 = arith.constant 0 : i32
    %c0_i32_0 = arith.constant 0 : i32
    return %1, %c0_i32 : i32, i32
  }
  func.func @transform_1(%arg0: i32, %arg1: i32) -> (i32, i32) {
    %c0_i32 = arith.constant 0 : i32
    %c0_i32_0 = arith.constant 0 : i32
    %c0_i32_1 = arith.constant 0 : i32
    return %c0_i32, %c0_i32_0 : i32, i32
  }
  func.func @transform_2(%arg0: i32, %arg1: i32) -> (i32, i32) {
    %c1_i32 = arith.constant 1 : i32
    %0 = arith.muli %arg0, %c1_i32 : i32
    %1 = arith.addi %0, %arg1 : i32
    %c0_i32 = arith.constant 0 : i32
    %c0_i32_0 = arith.constant 0 : i32
    return %1, %c0_i32 : i32, i32
  }
  func.func @transform_3(%arg0: i32, %arg1: i32) -> (i32, i32) {
    %c0_i32 = arith.constant 0 : i32
    %c0_i32_0 = arith.constant 0 : i32
    return %arg0, %c0_i32 : i32, i32
  }
  func.func @transform_4(%arg0: i32, %arg1: i32) -> (i32, i32) {
    %c0_i32 = arith.constant 0 : i32
    %c0_i32_0 = arith.constant 0 : i32
    return %arg0, %c0_i32 : i32, i32
  }
}

</mosaic_0001>

<bundles_post_ra>
// kernel: tpu_custom_call.1
= control target key start
LH: loop header
LB: loop body
LE: loop exit
PB: predicated region body
PF: predicated region fallthrough
CT: control target
= control target key end

     0   :  { %s1263_s0 = inlined_call_operand.hbm [shape: f32[32,128], index: 0, kind: input, shape index: {}]   ;;  %s1264_s1 = inlined_call_operand.hbm [shape: f32[128,128], index: 1, kind: input, shape index: {}]   ;;  %s1265_s2 = inlined_call_operand.hbm [shape: f32[32,128], index: 2, kind: output, shape index: {0}]   ;;  %s1266_s3 = inlined_call_operand.hbm [shape: f32[16,128], index: 3, kind: output, shape index: {1}]   ;;  %s1267_s4 = inlined_call_operand.hbm [shape: f32[16,128], index: 4, kind: output, shape index: {2}]  }
   0x1   :  { %1272 = sst [smem:[#allocation15_spill]] %s1264_s1 }
   0x2   :  { %10 = vsyncpa [#allocation3], 0 }
   0x3   :  { %12 = vsyncpa [#allocation3 + $0x1], 0 }
   0x4   :  { %13 = vsyncpa [#allocation6], 0 }
   0x5   :  { %14 = vsyncpa [#allocation4], 0 }
   0x6   :  { %16 = vsyncpa [#allocation4 + $0x1], 0 }
   0x7   :  { %17 = vsyncpa [#allocation9], 0 }
   0x8   :  { %19 = vsyncpa [#allocation9 + $0x1], 0  ;;  %s995_s15 = smov 0   ;;  %s997_s16 = smov 0  }
   0x9   :  { %s999_s17 = smov 0   ;;  %s1001_s18 = smov 0  }
   0xa   :  { %s1003_s19 = smov 0   ;;  %s1005_s20 = smov 0  }
   0xb LB: > { %s1026_s21 = sadd.s32 4294967295, %s958_s20   ;;  %s1268_s22 = sadd.s32 4294967294, %s958_s20   ;;  %s958_s20 = sphi %s1005_s20, %s25_s20   ;;  %s954_s19 = sphi %s1003_s19, %s1293_s19   ;;  %s950_s18 = sphi %s1001_s18, %s1292_s18   ;;  %s946_s17 = sphi %s999_s17, %s1291_s17   ;;  %s942_s16 = sphi %s997_s16, %s1290_s16   ;;  %s938_s15 = sphi %s995_s15, %s1289_s15  }
   0xc   : > { %p59_p0 = scmp.ne.s32.totalorder %s942_s16, %s938_s15  ;;  %p1271_p1 = scmp.eq.s32.totalorder %s1026_s21, 0 }
   0xd   : > { %p112_p3 = scmp.eq.s32.totalorder %s1268_s22, 1  ;;  %p600_p5 = scmp.ge.s32.totalorder %s958_s20, 1 }
   0xe   : > { %p1037_p4 = por %p1271_p1, %p59_p0  ;;  %p171_p7 = scmp.lt.s32.totalorder %s958_s20, 3 }
   0xf   : > { %p1042_p6 = por %p112_p3, %p59_p0  ;;  %s960_s26 = smov [#allocation5]  }
  0x10   : > { %p1047_p8 = pnand %p600_p5, %p171_p7  ;;  %s183_s27 = sshll.u32 %s960_s26, 4  ;;  %s184_s27 = int_to_ptr.vmem [resolvable:$true] %s183_s27 }
  0x11   : > { %s1274_s24 = scalar_select %p1042_p6, 1, 0 }
  0x12   : > { %p688_p9 = pneg %p1047_p8  ;;  %s37_s29 = sadd.s32 1, %s954_s19 }
  0x13   : > { %s775_s30 = scalar_lea.vmem %s184_s27, 2048  ;;  %p783_p5 = scmp.lt.s32.totalorder %s184_s27, %s184_s27 }
  0x14   : > { %p1056_p11 = pnand %p688_p9, %p1271_p1  ;;  %p776_p13 = scmp.ne.s32.totalorder %s184_s27, %s775_s30 }
  0x15   : > { %p784_p7 = scmp.lt.s32.totalorder %s775_s30, %s775_s30 }
  0x16   : > { %p766_p12 = pneg %p1056_p11 }
  0x17   : > { %p785_p2 = por %p784_p7, %p783_p5 }
  0x18   : > { %p778_p0 = pnand %p776_p13, %p766_p12 }
  0x1a   : > { %p779_p3 = pneg %p778_p0 }
  0x1c   : > { %p786_p6 = pnand %p785_p2, %p779_p3 }
  0x1e   : > { %789 = shalt.err (!%p786_p6)
}
  0x1f   : > { %s1269_s5 = smov 128   ;;  %s1270_s6 = smov 8  }
  0x20   : > { %s1277_s1 = sld [smem:[#allocation15_spill]]  ;;  %p39_p2 = scmp.ge.s32.totalorder %s37_s29, 2 }
  0x21   : > { %s46_s9 = sadd.s32 1, %s946_s17  ;;  %p53_p6 = scmp.ne.s32.totalorder %s946_s17, %s942_s16 }
  0x22   : > { %p54_p9 = scmp.eq.s32.totalorder %s958_s20, 0  ;;  %s1295_s29 = smov (%p39_p2, %s37_s29), 0 }
  0x23   : > { %p1279_p13 = scmp.eq.s32.totalorder %s1026_s21, 1  ;;  %s43_s12 = ssub.s32 %s954_s19, %s1295_s29 }
  0x24   : > { %p1077_p12 = por %p54_p9, %p53_p6  ;;  %p707_p3 = scmp.lt.s32.totalorder %s958_s20, 2 }
  0x25   : > { %p1083_p0 = por %p1279_p13, %p53_p6  ;;  %s197_s13 = sand.u32 1, %s946_s17  }
  0x26   : > { %691 = dma.hbm_to_vmem [thread:$0]  (!%p1056_p11), %s1277_s1, 2048, %s184_s27, [#allocation6], %s1269_s5, %s1269_s5, %s1270_s6  }
  0x27   : > { %p44_p11 = scmp.eq.s32.totalorder %s43_s12, 0  ;;  %s603_s14 = sshll.u32 %s197_s13, 4 }
  0x28   : > { %s621_s27 = sshll.u32 %s954_s19, 8  ;;  %s201_s8 = scalar_lea.vmem [#allocation2], %s603_s14 }
  0x29   : > { %s1092_s26 = scalar_select %p44_p11, %s946_s17, %s46_s9  }
  0x2a   : > { %s208_s7 = scalar_lea.hbm %s1263_s0, %s621_s27  ;;  %s209_s22 = sshll.u32 %s201_s8, 4  ;;  %s210_s22 = int_to_ptr.vmem [resolvable:$true] %s209_s22 }
  0x2b   : > { %p1100_p5 = pnand %p707_p3, %p1077_p12  ;;  %s198_s6 = scalar_lea.sflag [#allocation3], %s197_s13 }
  0x2c   : > { %s803_s12 = scalar_lea.vmem %s210_s22, 256  ;;  %s963_s9 = smov [#allocation2]  }
  0x2d   : > { %p792_p7 = pneg %p1100_p5  ;;  %p804_p2 = scmp.ne.s32.totalorder %s210_s22, %s803_s12 }
  0x2e   : > { %s808_s1 = sshll.u32 %s963_s9, 4  ;;  %s809_s1 = int_to_ptr.vmem [resolvable:$false] %s808_s1 }
  0x2f   : > { %p806_p6 = pnand %p804_p2, %p792_p7  ;;  %s810_s27 = scalar_lea.vmem %s809_s1, 512 }
  0x30   : > { %p811_p13 = scmp.lt.s32.totalorder %s210_s22, %s809_s1  ;;  %p812_p11 = scmp.lt.s32.totalorder %s810_s27, %s803_s12 }
  0x31   : > { %p807_p9 = pneg %p806_p6 }
  0x32   : > { %p813_p10 = por %p812_p11, %p811_p13 }
  0x34   : > { %p814_p1 = pnand %p813_p10, %p807_p9 }
  0x36   : > { %817 = shalt.err (!%p814_p1)
}
  0x37   : > { %s1282_s10 = smov 8   ;;  %s1283_s14 = smov 128  }
  0x38   : > { %695 = dma.hbm_to_vmem [thread:$0]  (!%p1100_p5), %s208_s7, 256, %s210_s22, %s198_s6, %s1283_s14, %s1283_s14, %s1282_s10  }
  0x39   : > { %221 = sbr.rel (%p1047_p8) target bundleno = 354 (0x162), region = 28  ;;  %s1114_s13 = sand.u32 (!%p1047_p8), 1, %s942_s16  }
  0x3a   : > { %s607_s1 = sshll.u32 (!%p1047_p8), %s1114_s13, 4  ;;  %s224_s28 = scalar_lea.sflag (!%p1047_p8), [#allocation3], %s1114_s13 }
  0x3b   : > { %s1120_s30 = scalar_lea.vmem (!%p1047_p8), [#allocation2], %s607_s1 }
  0x3e   : > { %921 = dma.done.wait (%p1037_p4), %s224_s28, 256  }
  0x3f   : > { %923 = vsyncadd (%p1037_p4), %s224_s28, 4294967040  ;;  %p1284_p1 = scmp.eq.s32.totalorder %s1026_s21, 0 }
  0x41   : > { %925 = dma.done.wait (%p1284_p1), [#allocation6], 2048   ;;  %p1285_p8 = pmov %p1284_p1 }
  0x42   : > { %v287_v0 = vld [vmem:[#allocation5 + $0x78] sm:$0xff]  ;;  %v286_v1 = vld [vmem:[#allocation5 + $0x70] sm:$0xff]  ;;  %v285_v2 = vld [vmem:[#allocation5 + $0x68] sm:$0xff]  ;;  %s610_s22 = sshll.u32 %s1114_s13, 3  ;;  %v964_v18 = vmov 0.0   ;;  %s251_s5 = scalar_lea.vmem [#allocation7], %s607_s1 }
  0x43   : > { %927 = vsyncadd (%p1285_p8), [#allocation6], 4294965248  ;;  %641 = vmatprep.subr.mxu0 %v287_v0  ;;  %v284_v3 = vld [vmem:[#allocation5 + $0x60] sm:$0xff]  ;;  %v283_v5 = vld [vmem:[#allocation5 + $0x58] sm:$0xff]  ;;  %s1133_s23 = scalar_lea.vmem [#allocation8], %s610_s22  ;;  %s1136_s25 = scalar_lea.vmem [#allocation10], %s610_s22 }
  0x44   : > { %642 = vmatpush3.msra.mxu0 %v287_v0  ;;  %v270_v4 = vld [vmem:[%s1120_s30] sm:$0xff]  ;;  %v281_v7 = vld [vmem:[#allocation5 + $0x48] sm:$0xff]  ;;  %v279_v9 = vld [vmem:[#allocation5 + $0x38] sm:$0xff]  ;;  %369 = vst [vmem:[%s1133_s23] sm:$0xff] %v964_v18  ;;  %s418_s6 = sshll.u32 %s251_s5, 4  ;;  %s622_s7 = sshll.u32 %s950_s18, 8  ;;  %s1142_s6 = int_to_ptr.vmem [resolvable:$true] %s418_s6 }
  0x45   : > { %643 = vmatprep.subr.mxu0 %v286_v1  ;;  %673 = vmatprep.mubr.f32.mxu0 %v270_v4  ;;  %v282_v6 = vld [vmem:[#allocation5 + $0x50] sm:$0xff]  ;;  %v280_v8 = vld [vmem:[#allocation5 + $0x40] sm:$0xff]  ;;  %v277_v11 = vld [vmem:[#allocation5 + $0x28] sm:$0xff]  ;;  %370 = vst [vmem:[%s1136_s25] sm:$0xff] %v964_v18  ;;  %s1147_s9 = scalar_lea.hbm %s1265_s2, %s622_s7  ;;  %s394_s27 = scalar_lea.sflag [#allocation4], %s1114_s13 }
  0x46   : > { %644 = vmatpush3.msra.mxu0 %v286_v1  ;;  %v278_v10 = vld [vmem:[#allocation5 + $0x30] sm:$0xff]  ;;  %v276_v12 = vld [vmem:[#allocation5 + $0x20] sm:$0xff]  ;;  %v275_v13 = vld [vmem:[#allocation5 + $0x18] sm:$0xff]  ;;  %s818_s10 = scalar_lea.vmem %s1142_s6, 256  ;;  %s965_s14 = smov [#allocation7]  }
  0x47   : > { %645 = vmatprep.subr.mxu0 %v285_v2  ;;  %v274_v14 = vld [vmem:[#allocation5 + $0x10] sm:$0xff]  ;;  %v273_v15 = vld [vmem:[#allocation5 + $0x8] sm:$0xff]  ;;  %v272_v16 = vld [vmem:[#allocation5] sm:$0xff]  ;;  %p819_p4 = scmp.ne.s32.totalorder %s1142_s6, %s818_s10  ;;  %s822_s1 = sshll.u32 %s965_s14, 4  ;;  %s823_s1 = int_to_ptr.vmem [resolvable:$false] %s822_s1 }
  0x48   : > { %646 = vmatpush3.msra.mxu0 %v285_v2  ;;  %v271_v17 = vld [vmem:[%s1120_s30 + $0x8] sm:$0xff]  ;;  %s824_s28 = scalar_lea.vmem %s823_s1, 512  ;;  %p825_p3 = scmp.lt.s32.totalorder %s1142_s6, %s823_s1 }
  0x49   : > { %647 = vmatprep.subr.mxu0 %v284_v3  ;;  %p820_p10 = pnand %p819_p4, %p1083_p0  ;;  %p826_p5 = scmp.lt.s32.totalorder %s824_s28, %s818_s10 }
  0x4a   : > { %648 = vmatpush3.msra.mxu0 %v284_v3 }
  0x4b   : > { %649 = vmatprep.subr.mxu0 %v283_v5  ;;  %p821_p12 = pneg %p820_p10  ;;  %p827_p7 = por %p826_p5, %p825_p3 }
  0x4c   : > { %650 = vmatpush3.msra.mxu0 %v283_v5 }
  0x4d   : > { %651 = vmatprep.subr.mxu0 %v282_v6  ;;  %p828_p2 = pnand %p827_p7, %p821_p12 }
  0x4e   : > { %652 = vmatpush3.msra.mxu0 %v282_v6 }
  0x4f   : > { %653 = vmatprep.subr.mxu0 %v281_v7 }
  0x50   : > { %654 = vmatpush3.msra.mxu0 %v281_v7 }
  0x51   : > { %655 = vmatprep.subr.mxu0 %v280_v8 }
  0x52   : > { %656 = vmatpush3.msra.mxu0 %v280_v8 }
  0x53   : > { %657 = vmatprep.subr.mxu0 %v279_v9 }
  0x54   : > { %658 = vmatpush3.msra.mxu0 %v279_v9 }
  0x55   : > { %659 = vmatprep.subr.mxu0 %v278_v10 }
  0x56   : > { %660 = vmatpush3.msra.mxu0 %v278_v10 }
  0x57   : > { %661 = vmatprep.subr.mxu0 %v277_v11 }
  0x58   : > { %662 = vmatpush3.msra.mxu0 %v277_v11 }
  0x59   : > { %663 = vmatprep.subr.mxu0 %v276_v12 }
  0x5a   : > { %664 = vmatpush3.msra.mxu0 %v276_v12 }
  0x5b   : > { %665 = vmatprep.subr.mxu0 %v275_v13 }
  0x5c   : > { %666 = vmatpush3.msra.mxu0 %v275_v13 }
  0x5d   : > { %667 = vmatprep.subr.mxu0 %v274_v14 }
  0x5e   : > { %668 = vmatpush3.msra.mxu0 %v274_v14 }
  0x5f   : > { %669 = vmatprep.subr.mxu0 %v273_v15 }
  0x60   : > { %670 = vmatpush3.msra.mxu0 %v273_v15 }
  0x61   : > { %671 = vmatprep.subr.mxu0 %v272_v16 }
  0x62   : > { %672 = vmatpush3.msra.mxu0 %v272_v16 }
  0x63   : > { %674 = vmatmul.mubr.f32.vlgmr.msra.gmra.mxu0 %v271_v17 }
 0x123   : > { %v675_v19 = vpop.f32.mrf.mxu0 }
 0x124   : > { %364 = vst [vmem:[%s251_s5 + $0x8] sm:$0xff] %v675_v19  ;;  %v383_v21 = vmul.f32 %v675_v19, %v675_v19 }
 0x125   : > { %v354_v20 = vpop.f32.mrf.mxu0 }
 0x126   : > { %363 = vst [vmem:[%s251_s5] sm:$0xff] %v354_v20  ;;  %v372_v22 = vadd.f32 %v675_v19, %v354_v20  ;;  %v382_v23 = vmul.f32 %v354_v20, %v354_v20 }
 0x127   : > { %831 = shalt.err (!%p828_p2)
}
 0x128   : > { %s832_s30 = scalar_lea.hbm %s1147_s9, 256  ;;  %s836_s7 = scalar_lea.hbm %s1265_s2, 512 }
 0x129   : > { %p833_p6 = scmp.ne.s32.totalorder %s1147_s9, %s832_s30  ;;  %p837_p11 = scmp.lt.s32.totalorder %s1147_s9, %s1265_s2 }
 0x12a   : > { %p838_p1 = scmp.lt.s32.totalorder %s836_s7, %s832_s30 }
 0x12b   : > { %p834_p9 = pnand %p833_p6, %p1083_p0 }
 0x12c   : > { %p839_p8 = por %p838_p1, %p837_p11 }
 0x12d   : > { %p835_p13 = pneg %p834_p9 }
 0x12f   : > { %p840_p4 = pnand %p839_p8, %p835_p13 }
 0x131   : > { %843 = shalt.err (!%p840_p4)
}
 0x132   : > { %s966_s10 = smov 128   ;;  %s967_s14 = smov 8   ;;  %v373_v24 = vrot.slane %v372_v22, 4  ;;  %v384_v25 = vadd.f32 %v383_v21, %v382_v23  ;;  %v371_v34 = vld [vmem:[%s1133_s23] sm:$0x1] }
 0x133   : > { %682 = dma.vmem_to_hbm [thread:$0]  (%p1083_p0), %s1142_s6, 256, %s1147_s9, %s394_s27, %s966_s10, %s966_s10, %s967_s14  }
 0x134   : > { %v374_v26 = vadd.f32 %v373_v24, %v372_v22  ;;  %v385_v27 = vrot.slane %v384_v25, 4  ;;  %s398_s1 = sand.u32 1, %s1026_s21   ;;  %s617_s28 = sshll.u32 %s950_s18, 7  ;;  %v381_v37 = vld [vmem:[%s1136_s25] sm:$0x1] }
 0x135   : > { %s434_s30 = sshll.u32 %s1133_s23, 4  ;;  %s447_s13 = sshll.u32 %s1136_s25, 4  ;;  %s1183_s30 = int_to_ptr.vmem [resolvable:$true] %s434_s30  ;;  %s1191_s13 = int_to_ptr.vmem [resolvable:$true] %s447_s13 }
 0x136   : > { %v375_v28 = vrot.slane %v374_v26, 2  ;;  %v386_v29 = vadd.f32 %v385_v27, %v384_v25  ;;  %s1181_s27 = scalar_lea.hbm %s1266_s3, %s617_s28  ;;  %s1189_s22 = scalar_lea.hbm %s1267_s4, %s617_s28 }
 0x137   : > { %s1193_s5 = scalar_lea.sflag [#allocation9], %s398_s1  ;;  %s844_s7 = scalar_lea.vmem %s1183_s30, 128 }
 0x138   : > { %v376_v30 = vadd.f32 %v375_v28, %v374_v26  ;;  %v387_v31 = vrot.slane %v386_v29, 2  ;;  %p845_p10 = scmp.ne.s32.totalorder %s1183_s30, %s844_s7  ;;  %s968_s8 = smov [#allocation8]  }
 0x139   : > { %s848_s12 = sshll.u32 %s968_s8, 4  ;;  %s849_s12 = int_to_ptr.vmem [resolvable:$false] %s848_s12 }
 0x13a   : > { %v377_v32 = vrot.slane %v376_v30, 1  ;;  %v388_v33 = vadd.f32 %v387_v31, %v386_v29  ;;  %p846_p12 = pnand %p845_p10, %p1083_p0  ;;  %s850_s10 = scalar_lea.vmem %s849_s12, 256 }
 0x13b   : > { %p851_p5 = scmp.lt.s32.totalorder %s1183_s30, %s849_s12  ;;  %p852_p7 = scmp.lt.s32.totalorder %s850_s10, %s844_s7 }
 0x13c   : > { %v378_v35 = vadd.f32 %v377_v32, %v376_v30  ;;  %v389_v36 = vrot.slane %v388_v33, 1  ;;  %p847_p3 = pneg %p846_p12 }
 0x13d   : > { %p853_p2 = por %p852_p7, %p851_p5 }
 0x13e   : > { %v390_v38 = vadd.f32 %v389_v36, %v388_v33  ;;  %v379_v39 = vadd.f32 %v378_v35, %v371_v34 }
 0x13f   : > { %p854_p6 = pnand %p853_p2, %p847_p3 }
 0x140   : > { %380 = vst [vmem:[%s1133_s23] sm:$0x1] %v379_v39  ;;  %v391_v40 = vadd.f32 %v390_v38, %v381_v37 }
 0x141   : > { %857 = shalt.err (!%p854_p6)
}
 0x142   : > { %s858_s23 = scalar_lea.hbm %s1181_s27, 128  ;;  %s862_s28 = scalar_lea.hbm %s1266_s3, 256 }
 0x143   : > { %p859_p9 = scmp.ne.s32.totalorder %s1181_s27, %s858_s23  ;;  %p863_p1 = scmp.lt.s32.totalorder %s1181_s27, %s1266_s3 }
 0x144   : > { %p864_p8 = scmp.lt.s32.totalorder %s862_s28, %s858_s23 }
 0x145   : > { %p860_p13 = pnand %p859_p9, %p1083_p0 }
 0x146   : > { %p865_p4 = por %p864_p8, %p863_p1 }
 0x147   : > { %p861_p11 = pneg %p860_p13 }
 0x149   : > { %p866_p10 = pnand %p865_p4, %p861_p11 }
 0x14b   : > { %869 = shalt.err (!%p866_p10)
}
 0x14c   : > { %683 = dma.vmem_to_hbm [thread:$0]  (%p1083_p0), %s1183_s30, 128, %s1181_s27, %s1193_s5   ;;  %392 = vst [vmem:[%s1136_s25] sm:$0x1] %v391_v40 }
 0x14d   : > { %s870_s18 = scalar_lea.vmem %s1191_s13, 128  ;;  %s969_s21 = smov [#allocation10]  }
 0x14e   : > { %p871_p12 = scmp.ne.s32.totalorder %s1191_s13, %s870_s18  ;;  %s874_s7 = sshll.u32 %s969_s21, 4  ;;  %s875_s7 = int_to_ptr.vmem [resolvable:$false] %s874_s7 }
 0x14f   : > { %s876_s8 = scalar_lea.vmem %s875_s7, 256  ;;  %p877_p7 = scmp.lt.s32.totalorder %s1191_s13, %s875_s7 }
 0x150   : > { %p872_p3 = pnand %p871_p12, %p1083_p0  ;;  %p878_p2 = scmp.lt.s32.totalorder %s876_s8, %s870_s18 }
 0x152   : > { %p873_p5 = pneg %p872_p3  ;;  %p879_p6 = por %p878_p2, %p877_p7 }
 0x154   : > { %p880_p9 = pnand %p879_p6, %p873_p5 }
 0x156   : > { %883 = shalt.err (!%p880_p9)
}
 0x157   : > { %s884_s30 = scalar_lea.hbm %s1189_s22, 128  ;;  %s888_s12 = scalar_lea.hbm %s1267_s4, 256 }
 0x158   : > { %p885_p13 = scmp.ne.s32.totalorder %s1189_s22, %s884_s30  ;;  %p889_p8 = scmp.lt.s32.totalorder %s1189_s22, %s1267_s4 }
 0x159   : > { %p890_p4 = scmp.lt.s32.totalorder %s888_s12, %s884_s30 }
 0x15a   : > { %p886_p11 = pnand %p885_p13, %p1083_p0 }
 0x15b   : > { %p891_p10 = por %p890_p4, %p889_p8 }
 0x15c   : > { %p887_p1 = pneg %p886_p11 }
 0x15e   : > { %p892_p12 = pnand %p891_p10, %p887_p1 }
 0x160   : > { %895 = shalt.err (!%p892_p12)
}
 0x161   : > { %684 = dma.vmem_to_hbm [thread:$0]  (%p1083_p0), %s1191_s13, 128, %s1189_s22, %s1193_s5  }
 0x162 PF: > { %s459_s14 = sand.u32 1, %s938_s15   ;;  %p1286_p3 = scmp.ne.s32.totalorder %s1274_s24, 0 }
 0x163   : > { %p1287_p5 = scmp.ge.s32.totalorder %s958_s20, 2  ;;  %s460_s1 = scalar_lea.sflag [#allocation4], %s459_s14 }
 0x165   : > { %p697_p7 = pnand %p1287_p5, %p1286_p3 }
 0x167   : > { %p698_p2 = pneg %p697_p7 }
 0x169   : > { %929 = dma.done.wait (%p698_p2), %s460_s1, 256  }
 0x16a   : > { %931 = vsyncadd (%p698_p2), %s460_s1, 4294967040  ;;  %s1288_s28 = sadd.s32 4294967294, %s958_s20  }
 0x16b   : > { %s468_s6 = sand.u32 1, %s1288_s28  }
 0x16c   : > { %s469_s11 = scalar_lea.sflag [#allocation9], %s468_s6 }
 0x16d   : > { %933 = dma.done.wait (%p698_p2), %s469_s11, 256  }
 0x16e   : > { %935 = vsyncadd (%p698_p2), %s469_s11, 4294967040  ;;  %s25_s20 = sadd.s32 1, %s958_s20   ;;  %s1289_s15 = smov %s942_s16 }
 0x16f   : > { %p22_p0 = scmp.ge.s32.totalorder %s25_s20, 4   ;;  %s1290_s16 = smov %s946_s17 }
 0x170   : > { %s1291_s17 = smov %s1092_s26  ;;  %s1292_s18 = smov %s954_s19 }
 0x171   : > { %s1293_s19 = smov %s1295_s29  ;;  %24 = sbr.rel (!%p22_p0) target bundleno = 11 (0xb), region = 113 }
 0x176   :  { %483 = vsyncpa [#allocation3], 1 }
 0x177   :  { %485 = vsyncpa [#allocation3 + $0x1], 1 }
 0x178   :  { %486 = vsyncpa [#allocation6], 1 }
 0x179   :  { %487 = vsyncpa [#allocation4], 1 }
 0x17a   :  { %489 = vsyncpa [#allocation4 + $0x1], 1 }
 0x17b   :  { %490 = vsyncpa [#allocation9], 1 }
 0x17c   :  { %492 = vsyncpa [#allocation9 + $0x1], 1 }

// kernel: tpu_custom_call.1
= control target key start
LH: loop header
LB: loop body
LE: loop exit
PB: predicated region body
PF: predicated region fallthrough
CT: control target
= control target key end

     0   :  { %s1263_s0 = inlined_call_operand.hbm [shape: f32[32,128], index: 0, kind: input, shape index: {}]   ;;  %s1264_s1 = inlined_call_operand.hbm [shape: f32[128,128], index: 1, kind: input, shape index: {}]   ;;  %s1265_s2 = inlined_call_operand.hbm [shape: f32[32,128], index: 2, kind: output, shape index: {0}]   ;;  %s1266_s3 = inlined_call_operand.hbm [shape: f32[16,128], index: 3, kind: output, shape index: {1}]   ;;  %s1267_s4 = inlined_call_operand.hbm [shape: f32[16,128], index: 4, kind: output, shape index: {2}]  }
   0x1   :  { %1272 = sst [smem:[#allocation15_spill]] %s1264_s1 }
   0x2   :  { %10 = vsyncpa [#allocation3], 0 }
   0x3   :  { %12 = vsyncpa [#allocation3 + $0x1], 0 }
   0x4   :  { %13 = vsyncpa [#allocation6], 0 }
   0x5   :  { %14 = vsyncpa [#allocation4], 0 }
   0x6   :  { %16 = vsyncpa [#allocation4 + $0x1], 0 }
   0x7   :  { %17 = vsyncpa [#allocation9], 0 }
   0x8   :  { %19 = vsyncpa [#allocation9 + $0x1], 0  ;;  %s995_s15 = smov 0   ;;  %s997_s16 = smov 0  }
   0x9   :  { %s999_s17 = smov 0   ;;  %s1001_s18 = smov 0  }
   0xa   :  { %s1003_s19 = smov 0   ;;  %s1005_s20 = smov 0  }
   0xb LB: > { %s1026_s21 = sadd.s32 4294967295, %s958_s20   ;;  %s1268_s22 = sadd.s32 4294967294, %s958_s20   ;;  %s958_s20 = sphi %s1005_s20, %s25_s20   ;;  %s954_s19 = sphi %s1003_s19, %s1293_s19   ;;  %s950_s18 = sphi %s1001_s18, %s1292_s18   ;;  %s946_s17 = sphi %s999_s17, %s1291_s17   ;;  %s942_s16 = sphi %s997_s16, %s1290_s16   ;;  %s938_s15 = sphi %s995_s15, %s1289_s15  }
   0xc   : > { %p59_p0 = scmp.ne.s32.totalorder %s942_s16, %s938_s15  ;;  %p1271_p1 = scmp.eq.s32.totalorder %s1026_s21, 0 }
   0xd   : > { %p112_p3 = scmp.eq.s32.totalorder %s1268_s22, 1  ;;  %p600_p5 = scmp.ge.s32.totalorder %s958_s20, 1 }
   0xe   : > { %p1037_p4 = por %p1271_p1, %p59_p0  ;;  %p171_p7 = scmp.lt.s32.totalorder %s958_s20, 3 }
   0xf   : > { %p1042_p6 = por %p112_p3, %p59_p0  ;;  %s960_s26 = smov [#allocation5]  }
  0x10   : > { %p1047_p8 = pnand %p600_p5, %p171_p7  ;;  %s183_s27 = sshll.u32 %s960_s26, 4  ;;  %s184_s27 = int_to_ptr.vmem [resolvable:$true] %s183_s27 }
  0x11   : > { %s1274_s24 = scalar_select %p1042_p6, 1, 0 }
  0x12   : > { %p688_p9 = pneg %p1047_p8  ;;  %s37_s29 = sadd.s32 1, %s954_s19 }
  0x13   : > { %s775_s30 = scalar_lea.vmem %s184_s27, 2048  ;;  %p783_p5 = scmp.lt.s32.totalorder %s184_s27, %s184_s27 }
  0x14   : > { %p1056_p11 = pnand %p688_p9, %p1271_p1  ;;  %p776_p13 = scmp.ne.s32.totalorder %s184_s27, %s775_s30 }
  0x15   : > { %p784_p7 = scmp.lt.s32.totalorder %s775_s30, %s775_s30 }
  0x16   : > { %p766_p12 = pneg %p1056_p11 }
  0x17   : > { %p785_p2 = por %p784_p7, %p783_p5 }
  0x18   : > { %p778_p0 = pnand %p776_p13, %p766_p12 }
  0x1a   : > { %p779_p3 = pneg %p778_p0 }
  0x1c   : > { %p786_p6 = pnand %p785_p2, %p779_p3 }
  0x1e   : > { %789 = shalt.err (!%p786_p6)
}
  0x1f   : > { %s1269_s5 = smov 128   ;;  %s1270_s6 = smov 8  }
  0x20   : > { %s1277_s1 = sld [smem:[#allocation15_spill]]  ;;  %p39_p2 = scmp.ge.s32.totalorder %s37_s29, 2 }
  0x21   : > { %s46_s9 = sadd.s32 1, %s946_s17  ;;  %p53_p6 = scmp.ne.s32.totalorder %s946_s17, %s942_s16 }
  0x22   : > { %p54_p9 = scmp.eq.s32.totalorder %s958_s20, 0  ;;  %s1295_s29 = smov (%p39_p2, %s37_s29), 0 }
  0x23   : > { %p1279_p13 = scmp.eq.s32.totalorder %s1026_s21, 1  ;;  %s43_s12 = ssub.s32 %s954_s19, %s1295_s29 }
  0x24   : > { %p1077_p12 = por %p54_p9, %p53_p6  ;;  %p707_p3 = scmp.lt.s32.totalorder %s958_s20, 2 }
  0x25   : > { %p1083_p0 = por %p1279_p13, %p53_p6  ;;  %s197_s13 = sand.u32 1, %s946_s17  }
  0x26   : > { %691 = dma.hbm_to_vmem [thread:$0]  (!%p1056_p11), %s1277_s1, 2048, %s184_s27, [#allocation6], %s1269_s5, %s1269_s5, %s1270_s6  }
  0x27   : > { %p44_p11 = scmp.eq.s32.totalorder %s43_s12, 0  ;;  %s603_s14 = sshll.u32 %s197_s13, 4 }
  0x28   : > { %s621_s27 = sshll.u32 %s954_s19, 8  ;;  %s201_s8 = scalar_lea.vmem [#allocation2], %s603_s14 }
  0x29   : > { %s1092_s26 = scalar_select %p44_p11, %s946_s17, %s46_s9  }
  0x2a   : > { %s208_s7 = scalar_lea.hbm %s1263_s0, %s621_s27  ;;  %s209_s22 = sshll.u32 %s201_s8, 4  ;;  %s210_s22 = int_to_ptr.vmem [resolvable:$true] %s209_s22 }
  0x2b   : > { %p1100_p5 = pnand %p707_p3, %p1077_p12  ;;  %s198_s6 = scalar_lea.sflag [#allocation3], %s197_s13 }
  0x2c   : > { %s803_s12 = scalar_lea.vmem %s210_s22, 256  ;;  %s963_s9 = smov [#allocation2]  }
  0x2d   : > { %p792_p7 = pneg %p1100_p5  ;;  %p804_p2 = scmp.ne.s32.totalorder %s210_s22, %s803_s12 }
  0x2e   : > { %s808_s1 = sshll.u32 %s963_s9, 4  ;;  %s809_s1 = int_to_ptr.vmem [resolvable:$false] %s808_s1 }
  0x2f   : > { %p806_p6 = pnand %p804_p2, %p792_p7  ;;  %s810_s27 = scalar_lea.vmem %s809_s1, 512 }
  0x30   : > { %p811_p13 = scmp.lt.s32.totalorder %s210_s22, %s809_s1  ;;  %p812_p11 = scmp.lt.s32.totalorder %s810_s27, %s803_s12 }
  0x31   : > { %p807_p9 = pneg %p806_p6 }
  0x32   : > { %p813_p10 = por %p812_p11, %p811_p13 }
  0x34   : > { %p814_p1 = pnand %p813_p10, %p807_p9 }
  0x36   : > { %817 = shalt.err (!%p814_p1)
}
  0x37   : > { %s1282_s10 = smov 8   ;;  %s1283_s14 = smov 128  }
  0x38   : > { %695 = dma.hbm_to_vmem [thread:$0]  (!%p1100_p5), %s208_s7, 256, %s210_s22, %s198_s6, %s1283_s14, %s1283_s14, %s1282_s10  }
  0x39   : > { %221 = sbr.rel (%p1047_p8) target bundleno = 354 (0x162), region = 28  ;;  %s1114_s13 = sand.u32 (!%p1047_p8), 1, %s942_s16  }
  0x3a   : > { %s607_s1 = sshll.u32 (!%p1047_p8), %s1114_s13, 4  ;;  %s224_s28 = scalar_lea.sflag (!%p1047_p8), [#allocation3], %s1114_s13 }
  0x3b   : > { %s1120_s30 = scalar_lea.vmem (!%p1047_p8), [#allocation2], %s607_s1 }
  0x3e   : > { %921 = dma.done.wait (%p1037_p4), %s224_s28, 256  }
  0x3f   : > { %923 = vsyncadd (%p1037_p4), %s224_s28, 4294967040  ;;  %p1284_p1 = scmp.eq.s32.totalorder %s1026_s21, 0 }
  0x41   : > { %925 = dma.done.wait (%p1284_p1), [#allocation6], 2048   ;;  %p1285_p8 = pmov %p1284_p1 }
  0x42   : > { %v287_v0 = vld [vmem:[#allocation5 + $0x78] sm:$0xff]  ;;  %v286_v1 = vld [vmem:[#allocation5 + $0x70] sm:$0xff]  ;;  %v285_v2 = vld [vmem:[#allocation5 + $0x68] sm:$0xff]  ;;  %s610_s22 = sshll.u32 %s1114_s13, 3  ;;  %v964_v18 = vmov 0.0   ;;  %s251_s5 = scalar_lea.vmem [#allocation7], %s607_s1 }
  0x43   : > { %927 = vsyncadd (%p1285_p8), [#allocation6], 4294965248  ;;  %641 = vmatprep.subr.mxu0 %v287_v0  ;;  %v284_v3 = vld [vmem:[#allocation5 + $0x60] sm:$0xff]  ;;  %v283_v5 = vld [vmem:[#allocation5 + $0x58] sm:$0xff]  ;;  %s1133_s23 = scalar_lea.vmem [#allocation8], %s610_s22  ;;  %s1136_s25 = scalar_lea.vmem [#allocation10], %s610_s22 }
  0x44   : > { %642 = vmatpush3.msra.mxu0 %v287_v0  ;;  %v270_v4 = vld [vmem:[%s1120_s30] sm:$0xff]  ;;  %v281_v7 = vld [vmem:[#allocation5 + $0x48] sm:$0xff]  ;;  %v279_v9 = vld [vmem:[#allocation5 + $0x38] sm:$0xff]  ;;  %369 = vst [vmem:[%s1133_s23] sm:$0xff] %v964_v18  ;;  %s418_s6 = sshll.u32 %s251_s5, 4  ;;  %s622_s7 = sshll.u32 %s950_s18, 8  ;;  %s1142_s6 = int_to_ptr.vmem [resolvable:$true] %s418_s6 }
  0x45   : > { %643 = vmatprep.subr.mxu0 %v286_v1  ;;  %673 = vmatprep.mubr.f32.mxu0 %v270_v4  ;;  %v282_v6 = vld [vmem:[#allocation5 + $0x50] sm:$0xff]  ;;  %v280_v8 = vld [vmem:[#allocation5 + $0x40] sm:$0xff]  ;;  %v277_v11 = vld [vmem:[#allocation5 + $0x28] sm:$0xff]  ;;  %370 = vst [vmem:[%s1136_s25] sm:$0xff] %v964_v18  ;;  %s1147_s9 = scalar_lea.hbm %s1265_s2, %s622_s7  ;;  %s394_s27 = scalar_lea.sflag [#allocation4], %s1114_s13 }
  0x46   : > { %644 = vmatpush3.msra.mxu0 %v286_v1  ;;  %v278_v10 = vld [vmem:[#allocation5 + $0x30] sm:$0xff]  ;;  %v276_v12 = vld [vmem:[#allocation5 + $0x20] sm:$0xff]  ;;  %v275_v13 = vld [vmem:[#allocation5 + $0x18] sm:$0xff]  ;;  %s818_s10 = scalar_lea.vmem %s1142_s6, 256  ;;  %s965_s14 = smov [#allocation7]  }
  0x47   : > { %645 = vmatprep.subr.mxu0 %v285_v2  ;;  %v274_v14 = vld [vmem:[#allocation5 + $0x10] sm:$0xff]  ;;  %v273_v15 = vld [vmem:[#allocation5 + $0x8] sm:$0xff]  ;;  %v272_v16 = vld [vmem:[#allocation5] sm:$0xff]  ;;  %p819_p4 = scmp.ne.s32.totalorder %s1142_s6, %s818_s10  ;;  %s822_s1 = sshll.u32 %s965_s14, 4  ;;  %s823_s1 = int_to_ptr.vmem [resolvable:$false] %s822_s1 }
  0x48   : > { %646 = vmatpush3.msra.mxu0 %v285_v2  ;;  %v271_v17 = vld [vmem:[%s1120_s30 + $0x8] sm:$0xff]  ;;  %s824_s28 = scalar_lea.vmem %s823_s1, 512  ;;  %p825_p3 = scmp.lt.s32.totalorder %s1142_s6, %s823_s1 }
  0x49   : > { %647 = vmatprep.subr.mxu0 %v284_v3  ;;  %p820_p10 = pnand %p819_p4, %p1083_p0  ;;  %p826_p5 = scmp.lt.s32.totalorder %s824_s28, %s818_s10 }
  0x4a   : > { %648 = vmatpush3.msra.mxu0 %v284_v3 }
  0x4b   : > { %649 = vmatprep.subr.mxu0 %v283_v5  ;;  %p821_p12 = pneg %p820_p10  ;;  %p827_p7 = por %p826_p5, %p825_p3 }
  0x4c   : > { %650 = vmatpush3.msra.mxu0 %v283_v5 }
  0x4d   : > { %651 = vmatprep.subr.mxu0 %v282_v6  ;;  %p828_p2 = pnand %p827_p7, %p821_p12 }
  0x4e   : > { %652 = vmatpush3.msra.mxu0 %v282_v6 }
  0x4f   : > { %653 = vmatprep.subr.mxu0 %v281_v7 }
  0x50   : > { %654 = vmatpush3.msra.mxu0 %v281_v7 }
  0x51   : > { %655 = vmatprep.subr.mxu0 %v280_v8 }
  0x52   : > { %656 = vmatpush3.msra.mxu0 %v280_v8 }
  0x53   : > { %657 = vmatprep.subr.mxu0 %v279_v9 }
  0x54   : > { %658 = vmatpush3.msra.mxu0 %v279_v9 }
  0x55   : > { %659 = vmatprep.subr.mxu0 %v278_v10 }
  0x56   : > { %660 = vmatpush3.msra.mxu0 %v278_v10 }
  0x57   : > { %661 = vmatprep.subr.mxu0 %v277_v11 }
  0x58   : > { %662 = vmatpush3.msra.mxu0 %v277_v11 }
  0x59   : > { %663 = vmatprep.subr.mxu0 %v276_v12 }
  0x5a   : > { %664 = vmatpush3.msra.mxu0 %v276_v12 }
  0x5b   : > { %665 = vmatprep.subr.mxu0 %v275_v13 }
  0x5c   : > { %666 = vmatpush3.msra.mxu0 %v275_v13 }
  0x5d   : > { %667 = vmatprep.subr.mxu0 %v274_v14 }
  0x5e   : > { %668 = vmatpush3.msra.mxu0 %v274_v14 }
  0x5f   : > { %669 = vmatprep.subr.mxu0 %v273_v15 }
  0x60   : > { %670 = vmatpush3.msra.mxu0 %v273_v15 }
  0x61   : > { %671 = vmatprep.subr.mxu0 %v272_v16 }
  0x62   : > { %672 = vmatpush3.msra.mxu0 %v272_v16 }
  0x63   : > { %674 = vmatmul.mubr.f32.vlgmr.msra.gmra.mxu0 %v271_v17 }
 0x123   : > { %v675_v19 = vpop.f32.mrf.mxu0 }
 0x124   : > { %364 = vst [vmem:[%s251_s5 + $0x8] sm:$0xff] %v675_v19  ;;  %v383_v21 = vmul.f32 %v675_v19, %v675_v19 }
 0x125   : > { %v354_v20 = vpop.f32.mrf.mxu0 }
 0x126   : > { %363 = vst [vmem:[%s251_s5] sm:$0xff] %v354_v20  ;;  %v372_v22 = vadd.f32 %v675_v19, %v354_v20  ;;  %v382_v23 = vmul.f32 %v354_v20, %v354_v20 }
 0x127   : > { %831 = shalt.err (!%p828_p2)
}
 0x128   : > { %s832_s30 = scalar_lea.hbm %s1147_s9, 256  ;;  %s836_s7 = scalar_lea.hbm %s1265_s2, 512 }
 0x129   : > { %p833_p6 = scmp.ne.s32.totalorder %s1147_s9, %s832_s30  ;;  %p837_p11 = scmp.lt.s32.totalorder %s1147_s9, %s1265_s2 }
 0x12a   : > { %p838_p1 = scmp.lt.s32.totalorder %s836_s7, %s832_s30 }
 0x12b   : > { %p834_p9 = pnand %p833_p6, %p1083_p0 }
 0x12c   : > { %p839_p8 = por %p838_p1, %p837_p11 }
 0x12d   : > { %p835_p13 = pneg %p834_p9 }
 0x12f   : > { %p840_p4 = pnand %p839_p8, %p835_p13 }
 0x131   : > { %843 = shalt.err (!%p840_p4)
}
 0x132   : > { %s966_s10 = smov 128   ;;  %s967_s14 = smov 8   ;;  %v373_v24 = vrot.slane %v372_v22, 4  ;;  %v384_v25 = vadd.f32 %v383_v21, %v382_v23  ;;  %v371_v34 = vld [vmem:[%s1133_s23] sm:$0x1] }
 0x133   : > { %682 = dma.vmem_to_hbm [thread:$0]  (%p1083_p0), %s1142_s6, 256, %s1147_s9, %s394_s27, %s966_s10, %s966_s10, %s967_s14  }
 0x134   : > { %v374_v26 = vadd.f32 %v373_v24, %v372_v22  ;;  %v385_v27 = vrot.slane %v384_v25, 4  ;;  %s398_s1 = sand.u32 1, %s1026_s21   ;;  %s617_s28 = sshll.u32 %s950_s18, 7  ;;  %v381_v37 = vld [vmem:[%s1136_s25] sm:$0x1] }
 0x135   : > { %s434_s30 = sshll.u32 %s1133_s23, 4  ;;  %s447_s13 = sshll.u32 %s1136_s25, 4  ;;  %s1183_s30 = int_to_ptr.vmem [resolvable:$true] %s434_s30  ;;  %s1191_s13 = int_to_ptr.vmem [resolvable:$true] %s447_s13 }
 0x136   : > { %v375_v28 = vrot.slane %v374_v26, 2  ;;  %v386_v29 = vadd.f32 %v385_v27, %v384_v25  ;;  %s1181_s27 = scalar_lea.hbm %s1266_s3, %s617_s28  ;;  %s1189_s22 = scalar_lea.hbm %s1267_s4, %s617_s28 }
 0x137   : > { %s1193_s5 = scalar_lea.sflag [#allocation9], %s398_s1  ;;  %s844_s7 = scalar_lea.vmem %s1183_s30, 128 }
 0x138   : > { %v376_v30 = vadd.f32 %v375_v28, %v374_v26  ;;  %v387_v31 = vrot.slane %v386_v29, 2  ;;  %p845_p10 = scmp.ne.s32.totalorder %s1183_s30, %s844_s7  ;;  %s968_s8 = smov [#allocation8]  }
 0x139   : > { %s848_s12 = sshll.u32 %s968_s8, 4  ;;  %s849_s12 = int_to_ptr.vmem [resolvable:$false] %s848_s12 }
 0x13a   : > { %v377_v32 = vrot.slane %v376_v30, 1  ;;  %v388_v33 = vadd.f32 %v387_v31, %v386_v29  ;;  %p846_p12 = pnand %p845_p10, %p1083_p0  ;;  %s850_s10 = scalar_lea.vmem %s849_s12, 256 }
 0x13b   : > { %p851_p5 = scmp.lt.s32.totalorder %s1183_s30, %s849_s12  ;;  %p852_p7 = scmp.lt.s32.totalorder %s850_s10, %s844_s7 }
 0x13c   : > { %v378_v35 = vadd.f32 %v377_v32, %v376_v30  ;;  %v389_v36 = vrot.slane %v388_v33, 1  ;;  %p847_p3 = pneg %p846_p12 }
 0x13d   : > { %p853_p2 = por %p852_p7, %p851_p5 }
 0x13e   : > { %v390_v38 = vadd.f32 %v389_v36, %v388_v33  ;;  %v379_v39 = vadd.f32 %v378_v35, %v371_v34 }
 0x13f   : > { %p854_p6 = pnand %p853_p2, %p847_p3 }
 0x140   : > { %380 = vst [vmem:[%s1133_s23] sm:$0x1] %v379_v39  ;;  %v391_v40 = vadd.f32 %v390_v38, %v381_v37 }
 0x141   : > { %857 = shalt.err (!%p854_p6)
}
 0x142   : > { %s858_s23 = scalar_lea.hbm %s1181_s27, 128  ;;  %s862_s28 = scalar_lea.hbm %s1266_s3, 256 }
 0x143   : > { %p859_p9 = scmp.ne.s32.totalorder %s1181_s27, %s858_s23  ;;  %p863_p1 = scmp.lt.s32.totalorder %s1181_s27, %s1266_s3 }
 0x144   : > { %p864_p8 = scmp.lt.s32.totalorder %s862_s28, %s858_s23 }
 0x145   : > { %p860_p13 = pnand %p859_p9, %p1083_p0 }
 0x146   : > { %p865_p4 = por %p864_p8, %p863_p1 }
 0x147   : > { %p861_p11 = pneg %p860_p13 }
 0x149   : > { %p866_p10 = pnand %p865_p4, %p861_p11 }
 0x14b   : > { %869 = shalt.err (!%p866_p10)
}
 0x14c   : > { %683 = dma.vmem_to_hbm [thread:$0]  (%p1083_p0), %s1183_s30, 128, %s1181_s27, %s1193_s5   ;;  %392 = vst [vmem:[%s1136_s25] sm:$0x1] %v391_v40 }
 0x14d   : > { %s870_s18 = scalar_lea.vmem %s1191_s13, 128  ;;  %s969_s21 = smov [#allocation10]  }
 0x14e   : > { %p871_p12 = scmp.ne.s32.totalorder %s1191_s13, %s870_s18  ;;  %s874_s7 = sshll.u32 %s969_s21, 4  ;;  %s875_s7 = int_to_ptr.vmem [resolvable:$false] %s874_s7 }
 0x14f   : > { %s876_s8 = scalar_lea.vmem %s875_s7, 256  ;;  %p877_p7 = scmp.lt.s32.totalorder %s1191_s13, %s875_s7 }
 0x150   : > { %p872_p3 = pnand %p871_p12, %p1083_p0  ;;  %p878_p2 = scmp.lt.s32.totalorder %s876_s8, %s870_s18 }
 0x152   : > { %p873_p5 = pneg %p872_p3  ;;  %p879_p6 = por %p878_p2, %p877_p7 }
 0x154   : > { %p880_p9 = pnand %p879_p6, %p873_p5 }
 0x156   : > { %883 = shalt.err (!%p880_p9)
}
 0x157   : > { %s884_s30 = scalar_lea.hbm %s1189_s22, 128  ;;  %s888_s12 = scalar_lea.hbm %s1267_s4, 256 }
 0x158   : > { %p885_p13 = scmp.ne.s32.totalorder %s1189_s22, %s884_s30  ;;  %p889_p8 = scmp.lt.s32.totalorder %s1189_s22, %s1267_s4 }
 0x159   : > { %p890_p4 = scmp.lt.s32.totalorder %s888_s12, %s884_s30 }
 0x15a   : > { %p886_p11 = pnand %p885_p13, %p1083_p0 }
 0x15b   : > { %p891_p10 = por %p890_p4, %p889_p8 }
 0x15c   : > { %p887_p1 = pneg %p886_p11 }
 0x15e   : > { %p892_p12 = pnand %p891_p10, %p887_p1 }
 0x160   : > { %895 = shalt.err (!%p892_p12)
}
 0x161   : > { %684 = dma.vmem_to_hbm [thread:$0]  (%p1083_p0), %s1191_s13, 128, %s1189_s22, %s1193_s5  }
 0x162 PF: > { %s459_s14 = sand.u32 1, %s938_s15   ;;  %p1286_p3 = scmp.ne.s32.totalorder %s1274_s24, 0 }
 0x163   : > { %p1287_p5 = scmp.ge.s32.totalorder %s958_s20, 2  ;;  %s460_s1 = scalar_lea.sflag [#allocation4], %s459_s14 }
 0x165   : > { %p697_p7 = pnand %p1287_p5, %p1286_p3 }
 0x167   : > { %p698_p2 = pneg %p697_p7 }
 0x169   : > { %929 = dma.done.wait (%p698_p2), %s460_s1, 256  }
 0x16a   : > { %931 = vsyncadd (%p698_p2), %s460_s1, 4294967040  ;;  %s1288_s28 = sadd.s32 4294967294, %s958_s20  }
 0x16b   : > { %s468_s6 = sand.u32 1, %s1288_s28  }
 0x16c   : > { %s469_s11 = scalar_lea.sflag [#allocation9], %s468_s6 }
 0x16d   : > { %933 = dma.done.wait (%p698_p2), %s469_s11, 256  }
 0x16e   : > { %935 = vsyncadd (%p698_p2), %s469_s11, 4294967040  ;;  %s25_s20 = sadd.s32 1, %s958_s20   ;;  %s1289_s15 = smov %s942_s16 }
 0x16f   : > { %p22_p0 = scmp.ge.s32.totalorder %s25_s20, 4   ;;  %s1290_s16 = smov %s946_s17 }
 0x170   : > { %s1291_s17 = smov %s1092_s26  ;;  %s1292_s18 = smov %s954_s19 }
 0x171   : > { %s1293_s19 = smov %s1295_s29  ;;  %24 = sbr.rel (!%p22_p0) target bundleno = 11 (0xb), region = 113 }
 0x176   :  { %483 = vsyncpa [#allocation3], 1 }
 0x177   :  { %485 = vsyncpa [#allocation3 + $0x1], 1 }
 0x178   :  { %486 = vsyncpa [#allocation6], 1 }
 0x179   :  { %487 = vsyncpa [#allocation4], 1 }
 0x17a   :  { %489 = vsyncpa [#allocation4 + $0x1], 1 }
 0x17b   :  { %490 = vsyncpa [#allocation9], 1 }
 0x17c   :  { %492 = vsyncpa [#allocation9 + $0x1], 1 }

</bundles_post_ra>
